<compile_context>
chip_gen: v5e
topology: v5e:2x2
jax: 0.10.0
libtpu: 0.0.40
codegen_flags: <defaults>
</compile_context>

<pallas_src>
import math
import jax
import jax.numpy as jnp
from jax.experimental import pallas as pl
from jax.experimental.pallas import tpu as pltpu


# ----------------------------- helpers ---------------------------------------

def _layernorm(x, gamma, beta, eps=1e-5):
    mu = jnp.mean(x, axis=-1, keepdims=True)
    var = jnp.mean((x - mu) ** 2, axis=-1, keepdims=True)
    return (x - mu) * jax.lax.rsqrt(var + eps) * gamma + beta


def _nbytes(a):
    return int(a.size) * jnp.dtype(a.dtype).itemsize


def _tpu_vmem_capacity_bytes():
    try:
        return int(pltpu.get_tpu_info().vmem_capacity_bytes)
    except Exception:
        return 128 << 20


def _device_kind():
    try:
        return jax.devices()[0].device_kind.lower()
    except Exception:
        return ""


def _rows_per_step_target():
    # v5e MXU is 128-wide; v6e/v7x are 256-wide -> aim for bigger LHS blocks.
    kind = _device_kind()
    if "v5 lite" in kind or "v5e" in kind or "v5litepod" in kind:
        return 128
    return 256


def _is_multi_tensorcore():
    # v7x: 2 TensorCores/chip and 64 MiB VMEM per TC.
    kind = _device_kind()
    if "v7" in kind:
        return True
    return _tpu_vmem_capacity_bytes() <= (64 << 20)


# ----------------------------- kernel -----------------------------------------

def _make_block_kernel(num_heads, head_dim, seq_len, batch_block, hidden, ffn_dim):
    S, H, bt, F = seq_len, hidden, batch_block, ffn_dim
    nh, hd = num_heads, head_dim
    R = bt * S                                           # rows handled per grid step

    def kernel(vl_ref, x_ref,
               wqkv_ref, bqkv_ref, wo_ref, bo_ref,
               g1_ref, be1_ref, w1_ref, bf1_ref, w2_ref, bf2_ref,
               g2_ref, be2_ref, o_ref, heads_ref):
        b0 = pl.program_id(0) * bt                       # first batch elem of block

        x = x_ref[...]                                   # (R, H) f32 (residual path)
        xb = x.astype(jnp.bfloat16)

        # ---- fused Q|K|V projection: one lane-dense MXU matmul; bias add in f32,
        #      single cast to bf16 (1/sqrt(hd) already folded into Wq / bq). ----
        qkv = jnp.dot(xb, wqkv_ref[...], preferred_element_type=jnp.float32)
        qkv = (qkv + bqkv_ref[...]).astype(jnp.bfloat16).reshape(bt, S, 3 * H)

        # ---- key-axis validity mask: one compare per grid step, hoisted out of
        #      the head loop (no per-batch (1,S,S) broadcast + concatenate). ----
        lens = jnp.concatenate(
            [jnp.broadcast_to(vl_ref[b0 + j], (1, 1, 1)) for j in range(bt)],
            axis=0)                                      # (bt,1,1) int32
        keep = jax.lax.broadcasted_iota(jnp.int32, (bt, S, S), 2) < lens

        # ---- multi-head attention.  Each head's output goes into its
        #      lane-contiguous column slice of the VMEM scratch (no Python-value
        #      accumulator across the unrolled loop); a single full-K (R,H)x(H,H)
        #      matmul then projects all heads through Wo at once. ----
        for h in range(nh):
            q = qkv[:, :, h * hd:(h + 1) * hd]           # (bt,S,hd) bf16, pre-scaled
            k = qkv[:, :, H + h * hd:H + (h + 1) * hd]
            v = qkv[:, :, 2 * H + h * hd:2 * H + (h + 1) * hd]

            s = jnp.einsum('bqd,bkd->bqk', q, k,
                           preferred_element_type=jnp.float32)        # (bt,S,S) f32
            s = jnp.where(keep, s, jnp.float32(-1e6))                 # d2l mask
            s = s - jnp.max(s, axis=-1, keepdims=True)
            p = jnp.exp(s)
            p = p * pl.reciprocal(jnp.sum(p, axis=-1, keepdims=True), approx=True)

            oh = jnp.einsum('bqk,bkd->bqd', p.astype(jnp.bfloat16), v,
                            preferred_element_type=jnp.float32)       # (bt,S,hd)
            heads_ref[:, h * hd:(h + 1) * hd] = (
                oh.reshape(R, hd).astype(jnp.bfloat16))

        attn = jnp.dot(heads_ref[...], wo_ref[...],
                       preferred_element_type=jnp.float32) + bo_ref[...]   # (R, H)

        # ---- AddNorm 1 (dropout is identity in eval mode) ----
        y = _layernorm(x + attn, g1_ref[...], be1_ref[...])

        # ---- position-wise FFN: H -> F (ReLU) -> H (bf16 matmuls, f32 acc) ----
        # TODO(synk): at BERT-base on v7x, K-tile over F (chunks of 512-1024) and
        # single-buffer the weight BlockSpecs to fit the 64 MiB/TC VMEM.
        hmid = jnp.maximum(
            jnp.dot(y.astype(jnp.bfloat16), w1_ref[...],
                    preferred_element_type=jnp.float32) + bf1_ref[...], 0.0)
        f = jnp.dot(hmid.astype(jnp.bfloat16), w2_ref[...],
                    preferred_element_type=jnp.float32) + bf2_ref[...]

        # ---- AddNorm 2 ----
        o_ref[...] = _layernorm(y + f, g2_ref[...], be2_ref[...])

    return kernel


# ----------------------------- wrapper -----------------------------------------

def prepare_params(params, num_heads):
    """One-time weight prep, hoisted out of the per-forward path:
       fuse Wq|Wk|Wv (with 1/sqrt(head_dim) folded into the Q columns) and cast
       matmul weights to bf16; biases and layernorm params stay f32."""
    prepped = {'tok_emb': params['tok_emb'], 'seg_emb': params['seg_emb'],
               'pos': params['pos'], 'layers': []}
    for p in params['layers']:
        H = p['wq'].shape[0]
        hd = H // num_heads
        scale = 1.0 / math.sqrt(hd)
        wqkv = jnp.concatenate([p['wq'] * scale, p['wk'], p['wv']],
                               axis=1).astype(jnp.bfloat16)                 # (H, 3H)
        bqkv = jnp.concatenate([p['bq'] * scale, p['bk'], p['bv']], axis=1)  # (1,3H)
        prepped['layers'].append({
            'wqkv': wqkv, 'bqkv': bqkv,
            'wo': p['wo'].astype(jnp.bfloat16), 'bo': p['bo'],
            'ln1_g': p['ln1_g'], 'ln1_b': p['ln1_b'],
            'w1': p['w1'].astype(jnp.bfloat16), 'b1': p['b1'],
            'w2': p['w2'].astype(jnp.bfloat16), 'b2': p['b2'],
            'ln2_g': p['ln2_g'], 'ln2_b': p['ln2_b'],
        })
    return prepped


def _pick_batch_block(B, S, rows_target, prefer_multistep):
    bt = max(1, min(B, max(1, rows_target // max(1, S))))
    if prefer_multistep and B >= 2:
        bt = min(bt, max(1, B // 2))       # >=2 grid steps so both v7x TCs get work
    while B % bt:
        bt -= 1
    # keep the block's sublane dim (bt*S) 8-aligned unless the block is the whole array
    if (bt * S) % 8 != 0 and bt != B:
        bt = B
    return bt


def encoder_block(x2d, valid_len, lp, num_heads, batch, seq_len):
    B, S = batch, seq_len
    H = x2d.shape[1]
    F = lp['w1'].shape[1]
    assert H % num_heads == 0, "num_hiddens must be divisible by num_heads"
    hd = H // num_heads

    bt = _pick_batch_block(B, S, _rows_per_step_target(), _is_multi_tensorcore())
    R = bt * S
    grid = (B // bt,)

    kernel = _make_block_kernel(num_heads, hd, S, bt, H, F)

    def full(shape):
        return pl.BlockSpec(shape, lambda i: (0,) * len(shape))

    weights = (lp['wqkv'], lp['bqkv'], lp['wo'], lp['bo'],
               lp['ln1_g'], lp['ln1_b'], lp['w1'], lp['b1'],
               lp['w2'], lp['b2'], lp['ln2_g'], lp['ln2_b'])

    in_specs = [
        pl.BlockSpec(memory_space=pltpu.MemorySpace.SMEM),     # valid_len (scalars)
        pl.BlockSpec((R, H), lambda i: (i, 0)),                # X rows block
    ] + [full(w.shape) for w in weights]
    out_specs = pl.BlockSpec((R, H), lambda i: (i, 0))

    # vmem limit: derive from physical VMEM with ~20% headroom (may rise above
    # 64 MiB on v5e/v6e's 128 MiB parts; stays well below v7x's 64 MiB per TC).
    resident = sum(_nbytes(w) for w in weights)
    io_bytes = 2 * 2 * R * H * 4                         # double-buffered in/out blocks
    act_bytes = R * (16 * H + 8 * F) + 3 * bt * S * S * 4
    want = 2 * resident + io_bytes + act_bytes + (8 << 20)
    cap = _tpu_vmem_capacity_bytes()
    vmem_limit = int(max(16 << 20, min(want, int(cap * 0.8))))

    fn = pl.pallas_call(
        kernel,
        grid=grid,
        in_specs=in_specs,
        out_specs=out_specs,
        out_shape=jax.ShapeDtypeStruct((B * S, H), jnp.float32),
        scratch_shapes=[pltpu.VMEM((R, H), jnp.bfloat16)],    # concat'd head outputs
        input_output_aliases={1: 0},                          # X is dead after the layer
        compiler_params=pltpu.CompilerParams(
            dimension_semantics=("parallel",),
            vmem_limit_bytes=vmem_limit),
    )
    return fn(valid_len, x2d, *weights)


def bert_encoder_forward(tokens, segments, valid_len, prepped, num_heads):
    # Embedding lookups + learned positional encoding: plain-JAX glue (gather).
    X = (prepped['tok_emb'][tokens]
         + prepped['seg_emb'][segments]
         + prepped['pos'][:, :tokens.shape[1], :])
    B, S, H = X.shape
    x2d = X.reshape(B * S, H)
    for lp in prepped['layers']:
        x2d = encoder_block(x2d, valid_len, lp, num_heads, B, S)
    return x2d.reshape(B, S, H)


# ----------------------------- reference & init -------------------------------

def reference_forward(tokens, segments, valid_len, params, num_heads):
    X = (params['tok_emb'][tokens] + params['seg_emb'][segments]
         + params['pos'][:, :tokens.shape[1], :])
    B, S, H = X.shape
    hd = H // num_heads
    for p in params['layers']:
        q = X @ p['wq'] + p['bq']
        k = X @ p['wk'] + p['bk']
        v = X @ p['wv'] + p['bv']

        def heads(t):
            return t.reshape(B, S, num_heads, hd).transpose(0, 2, 1, 3)

        s = jnp.einsum('bhqd,bhkd->bhqk', heads(q), heads(k)) / math.sqrt(hd)
        mask = (jnp.arange(S)[None, None, None, :]
                < valid_len[:, None, None, None])
        s = jnp.where(mask, s, -1e6)
        a = jax.nn.softmax(s, axis=-1)
        o = jnp.einsum('bhqk,bhkd->bhqd', a, heads(v))
        o = o.transpose(0, 2, 1, 3).reshape(B, S, H) @ p['wo'] + p['bo']
        Y = _layernorm(X + o, p['ln1_g'], p['ln1_b'])
        f = jnp.maximum(Y @ p['w1'] + p['b1'], 0.0) @ p['w2'] + p['b2']
        X = _layernorm(Y + f, p['ln2_g'], p['ln2_b'])
    return X


def init_params(key, num_layers, num_hiddens, ffn_input, vocab_size, max_len=64):
    H, F = num_hiddens, ffn_input
    keys = jax.random.split(key, 3 + num_layers)
    params = {
        'tok_emb': 0.02 * jax.random.normal(keys[0], (vocab_size, H), jnp.float32),
        'seg_emb': 0.02 * jax.random.normal(keys[1], (2, H), jnp.float32),
        'pos':     0.02 * jax.random.normal(keys[2], (1, max_len, H), jnp.float32),
        'layers': [],
    }
    for i in range(num_layers):
        lk = jax.random.split(keys[3 + i], 6)
        layer = {
            'wq': 0.05 * jax.random.normal(lk[0], (H, H), jnp.float32), 'bq': jnp.zeros((1, H), jnp.float32),
            'wk': 0.05 * jax.random.normal(lk[1], (H, H), jnp.float32), 'bk': jnp.zeros((1, H), jnp.float32),
            'wv': 0.05 * jax.random.normal(lk[2], (H, H), jnp.float32), 'bv': jnp.zeros((1, H), jnp.float32),
            'wo': 0.05 * jax.random.normal(lk[3], (H, H), jnp.float32), 'bo': jnp.zeros((1, H), jnp.float32),
            'ln1_g': jnp.ones((1, H), jnp.float32), 'ln1_b': jnp.zeros((1, H), jnp.float32),
            'w1': 0.05 * jax.random.normal(lk[4], (H, F), jnp.float32), 'b1': jnp.zeros((1, F), jnp.float32),
            'w2': 0.05 * jax.random.normal(lk[5], (F, H), jnp.float32), 'b2': jnp.zeros((1, H), jnp.float32),
            'ln2_g': jnp.ones((1, H), jnp.float32), 'ln2_b': jnp.zeros((1, H), jnp.float32),
        }
        params['layers'].append(layer)
    return params


if __name__ == "__main__":
    # Small config consistent with the module's forward.
    B, S = 2, 8
    num_layers, num_hiddens, num_heads = 2, 32, 4
    ffn_input, vocab_size = 64, 50

    root = jax.random.PRNGKey(0)
    k_tok, k_seg, k_par = jax.random.split(root, 3)

    tokens = jax.random.randint(k_tok, (B, S), 0, vocab_size, dtype=jnp.int32)
    segments = jax.random.randint(k_seg, (B, S), 0, 2, dtype=jnp.int32)
    valid_seq_len = jnp.array([S, 5], dtype=jnp.int32)

    params = init_params(k_par, num_layers, num_hiddens, ffn_input, vocab_size)
    prepped = prepare_params(params, num_heads)            # one-time weight prep

    out = bert_encoder_forward(tokens, segments, valid_seq_len, prepped, num_heads)
    out = jax.block_until_ready(out)

    assert out.shape == (B, S, num_hiddens)
    assert bool(jnp.all(jnp.isfinite(out)))

    # bf16 MXU inputs + approx reciprocal => loose tolerance vs the f32 reference.
    ref = reference_forward(tokens, segments, valid_seq_len, params, num_heads)
    assert bool(jnp.max(jnp.abs(out - ref)) < 0.2)

    print("KERNEL_OK")
</pallas_src>

<mosaic_0001>
module attributes {stable_mosaic.version = 11 : i64} {
  func.func @kernel(%arg0: i32, %arg1: memref<2xi32, #tpu.memory_space<smem>>, %arg2: memref<16x32xf32, #tpu.memory_space<vmem>>, %arg3: memref<32x96xbf16, #tpu.memory_space<vmem>>, %arg4: memref<1x96xf32, #tpu.memory_space<vmem>>, %arg5: memref<32x32xbf16, #tpu.memory_space<vmem>>, %arg6: memref<1x32xf32, #tpu.memory_space<vmem>>, %arg7: memref<1x32xf32, #tpu.memory_space<vmem>>, %arg8: memref<1x32xf32, #tpu.memory_space<vmem>>, %arg9: memref<32x64xbf16, #tpu.memory_space<vmem>>, %arg10: memref<1x64xf32, #tpu.memory_space<vmem>>, %arg11: memref<64x32xbf16, #tpu.memory_space<vmem>>, %arg12: memref<1x32xf32, #tpu.memory_space<vmem>>, %arg13: memref<1x32xf32, #tpu.memory_space<vmem>>, %arg14: memref<1x32xf32, #tpu.memory_space<vmem>>, %arg15: memref<16x32xf32, #tpu.memory_space<vmem>>, %arg16: memref<16x32xbf16, #tpu.memory_space<vmem>>) attributes {dimension_semantics = [#tpu.dimension_semantics<parallel>], iteration_bounds = array<i64: 1>, scalar_prefetch = 0 : i64, scratch_operands = 1 : i64, tpu.core_type = #tpu.core_type<tc>, window_params = [{transform_indices = @transform_0, window_bounds = array<i64: 2>}, {transform_indices = @transform_1, window_bounds = array<i64: 16, 32>}, {pipeline_mode = #tpu.pipeline_mode<synchronous>, transform_indices = @transform_2, window_bounds = array<i64: 32, 96>}, {pipeline_mode = #tpu.pipeline_mode<synchronous>, transform_indices = @transform_3, window_bounds = array<i64: 1, 96>}, {pipeline_mode = #tpu.pipeline_mode<synchronous>, transform_indices = @transform_4, window_bounds = array<i64: 32, 32>}, {pipeline_mode = #tpu.pipeline_mode<synchronous>, transform_indices = @transform_5, window_bounds = array<i64: 1, 32>}, {pipeline_mode = #tpu.pipeline_mode<synchronous>, transform_indices = @transform_6, window_bounds = array<i64: 1, 32>}, {pipeline_mode = #tpu.pipeline_mode<synchronous>, transform_indices = @transform_7, window_bounds = array<i64: 1, 32>}, {pipeline_mode = #tpu.pipeline_mode<synchronous>, transform_indices = @transform_8, window_bounds = array<i64: 32, 64>}, {pipeline_mode = #tpu.pipeline_mode<synchronous>, transform_indices = @transform_9, window_bounds = array<i64: 1, 64>}, {pipeline_mode = #tpu.pipeline_mode<synchronous>, transform_indices = @transform_10, window_bounds = array<i64: 64, 32>}, {pipeline_mode = #tpu.pipeline_mode<synchronous>, transform_indices = @transform_11, window_bounds = array<i64: 1, 32>}, {pipeline_mode = #tpu.pipeline_mode<synchronous>, transform_indices = @transform_12, window_bounds = array<i64: 1, 32>}, {pipeline_mode = #tpu.pipeline_mode<synchronous>, transform_indices = @transform_13, window_bounds = array<i64: 1, 32>}, {transform_indices = @transform_14, window_bounds = array<i64: 16, 32>}]} {
    %c2_i32 = arith.constant 2 : i32
    %0 = arith.muli %arg0, %c2_i32 : i32
    %c0 = arith.constant 0 : index
    %c0_0 = arith.constant 0 : index
    %1 = vector.load %arg2[%c0, %c0_0] : memref<16x32xf32, #tpu.memory_space<vmem>>, vector<16x32xf32>
    %2 = arith.truncf %1 : vector<16x32xf32> to vector<16x32xbf16>
    %c0_1 = arith.constant 0 : index
    %c0_2 = arith.constant 0 : index
    %3 = vector.load %arg3[%c0_1, %c0_2] : memref<32x96xbf16, #tpu.memory_space<vmem>>, vector<32x96xbf16>
    %cst = arith.constant dense<0.000000e+00> : vector<16x96xf32>
    %4 = tpu.matmul %2, %3, %cst {dimension_numbers = #tpu.dot_dimension_numbers<[1], [0], [0], [1], [0, 0, 1, 1], [], []>} : vector<16x32xbf16>, vector<32x96xbf16>, vector<16x96xf32> -> vector<16x96xf32>
    %c0_3 = arith.constant 0 : index
    %c0_4 = arith.constant 0 : index
    %5 = vector.load %arg4[%c0_3, %c0_4] : memref<1x96xf32, #tpu.memory_space<vmem>>, vector<1x96xf32>
    %6 = vector.broadcast %5 : vector<1x96xf32> to vector<16x96xf32>
    %7 = arith.addf %4, %6 : vector<16x96xf32>
    %8 = arith.truncf %7 : vector<16x96xf32> to vector<16x96xbf16>
    %9 = vector.shape_cast %8 : vector<16x96xbf16> to vector<2x8x96xbf16>
    %c0_i32 = arith.constant 0 : i32
    %10 = arith.addi %0, %c0_i32 : i32
    %11 = arith.index_cast %10 : i32 to index
    %12 = memref.load %arg1[%11] : memref<2xi32, #tpu.memory_space<smem>>
    %13 = vector.broadcast %12 : i32 to vector<1x1x1xi32>
    %c1_i32 = arith.constant 1 : i32
    %14 = arith.addi %0, %c1_i32 : i32
    %15 = arith.index_cast %14 : i32 to index
    %16 = memref.load %arg1[%15] : memref<2xi32, #tpu.memory_space<smem>>
    %17 = vector.broadcast %16 : i32 to vector<1x1x1xi32>
    %18 = tpu.concatenate %13, %17 in 0 : vector<1x1x1xi32>, vector<1x1x1xi32> -> vector<2x1x1xi32>
    %19 = tpu.iota {dimensions = array<i32: 2>} : vector<2x8x8xi32>
    %20 = vector.broadcast %18 : vector<2x1x1xi32> to vector<2x8x8xi32>
    %21 = arith.cmpi slt, %19, %20 : vector<2x8x8xi32>
    %22 = vector.extract_strided_slice %9 {offsets = [0, 0, 0], sizes = [2, 8, 8], strides = [1, 1, 1]} : vector<2x8x96xbf16> to vector<2x8x8xbf16>
    %23 = vector.extract_strided_slice %9 {offsets = [0, 0, 32], sizes = [2, 8, 8], strides = [1, 1, 1]} : vector<2x8x96xbf16> to vector<2x8x8xbf16>
    %24 = vector.extract_strided_slice %9 {offsets = [0, 0, 64], sizes = [2, 8, 8], strides = [1, 1, 1]} : vector<2x8x96xbf16> to vector<2x8x8xbf16>
    "tpu.trace_start"() <{level = 10 : i32, message = "bqd,bkd->bqk"}> : () -> ()
    %cst_5 = arith.constant dense<0.000000e+00> : vector<2x8x8xf32>
    %25 = tpu.matmul %22, %23, %cst_5 {dimension_numbers = #tpu.dot_dimension_numbers<[2], [2], [1], [1], [0, 0, 0, 1, 1, 1], [0], [0]>} : vector<2x8x8xbf16>, vector<2x8x8xbf16>, vector<2x8x8xf32> -> vector<2x8x8xf32>
    %cst_6 = arith.constant -1.000000e+06 : f32
    "tpu.trace_stop"() : () -> ()
    %26 = vector.broadcast %cst_6 : f32 to vector<2x8x8xf32>
    %27 = arith.select %21, %25, %26 : vector<2x8x8xi1>, vector<2x8x8xf32>
    %cst_7 = arith.constant dense<0xFF800000> : vector<2x8xf32>
    %28 = vector.multi_reduction <maximumf>, %27, %cst_7 [2] : vector<2x8x8xf32> to vector<2x8xf32>
    %29 = vector.shape_cast %28 : vector<2x8xf32> to vector<2x8x1xf32>
    %30 = vector.broadcast %29 : vector<2x8x1xf32> to vector<2x8x8xf32>
    %31 = arith.subf %27, %30 : vector<2x8x8xf32>
    %32 = math.exp %31 : vector<2x8x8xf32>
    %cst_8 = arith.constant dense<0.000000e+00> : vector<2x8xf32>
    %33 = vector.multi_reduction <add>, %32, %cst_8 [2] : vector<2x8x8xf32> to vector<2x8xf32>
    %34 = vector.shape_cast %33 : vector<2x8xf32> to vector<2x8x1xf32>
    %35 = tpu.reciprocal %34 {approx = true} : vector<2x8x1xf32> -> vector<2x8x1xf32>
    %36 = vector.broadcast %35 : vector<2x8x1xf32> to vector<2x8x8xf32>
    %37 = arith.mulf %32, %36 : vector<2x8x8xf32>
    %38 = arith.truncf %37 : vector<2x8x8xf32> to vector<2x8x8xbf16>
    "tpu.trace_start"() <{level = 10 : i32, message = "bqk,bkd->bqd"}> : () -> ()
    %cst_9 = arith.constant dense<0.000000e+00> : vector<2x8x8xf32>
    %39 = tpu.matmul %38, %24, %cst_9 {dimension_numbers = #tpu.dot_dimension_numbers<[2], [1], [1], [2], [0, 0, 0, 1, 1, 2], [0], [0]>} : vector<2x8x8xbf16>, vector<2x8x8xbf16>, vector<2x8x8xf32> -> vector<2x8x8xf32>
    "tpu.trace_stop"() : () -> ()
    %40 = vector.shape_cast %39 : vector<2x8x8xf32> to vector<16x8xf32>
    %41 = arith.truncf %40 : vector<16x8xf32> to vector<16x8xbf16>
    %c0_10 = arith.constant 0 : index
    %c0_11 = arith.constant 0 : index
    %42 = vector.load %arg16[%c0_10, %c0_11] : memref<16x32xbf16, #tpu.memory_space<vmem>>, vector<16x8xbf16>
    tpu.vector_store %arg16[%c0_10, %c0_11], %41 {strides = array<i32>} : memref<16x32xbf16, #tpu.memory_space<vmem>>, vector<16x8xbf16>,
    %43 = vector.extract_strided_slice %9 {offsets = [0, 0, 8], sizes = [2, 8, 8], strides = [1, 1, 1]} : vector<2x8x96xbf16> to vector<2x8x8xbf16>
    %44 = vector.extract_strided_slice %9 {offsets = [0, 0, 40], sizes = [2, 8, 8], strides = [1, 1, 1]} : vector<2x8x96xbf16> to vector<2x8x8xbf16>
    %45 = vector.extract_strided_slice %9 {offsets = [0, 0, 72], sizes = [2, 8, 8], strides = [1, 1, 1]} : vector<2x8x96xbf16> to vector<2x8x8xbf16>
    "tpu.trace_start"() <{level = 10 : i32, message = "bqd,bkd->bqk"}> : () -> ()
    %cst_12 = arith.constant dense<0.000000e+00> : vector<2x8x8xf32>
    %46 = tpu.matmul %43, %44, %cst_12 {dimension_numbers = #tpu.dot_dimension_numbers<[2], [2], [1], [1], [0, 0, 0, 1, 1, 1], [0], [0]>} : vector<2x8x8xbf16>, vector<2x8x8xbf16>, vector<2x8x8xf32> -> vector<2x8x8xf32>
    %cst_13 = arith.constant -1.000000e+06 : f32
    "tpu.trace_stop"() : () -> ()
    %47 = vector.broadcast %cst_13 : f32 to vector<2x8x8xf32>
    %48 = arith.select %21, %46, %47 : vector<2x8x8xi1>, vector<2x8x8xf32>
    %cst_14 = arith.constant dense<0xFF800000> : vector<2x8xf32>
    %49 = vector.multi_reduction <maximumf>, %48, %cst_14 [2] : vector<2x8x8xf32> to vector<2x8xf32>
    %50 = vector.shape_cast %49 : vector<2x8xf32> to vector<2x8x1xf32>
    %51 = vector.broadcast %50 : vector<2x8x1xf32> to vector<2x8x8xf32>
    %52 = arith.subf %48, %51 : vector<2x8x8xf32>
    %53 = math.exp %52 : vector<2x8x8xf32>
    %cst_15 = arith.constant dense<0.000000e+00> : vector<2x8xf32>
    %54 = vector.multi_reduction <add>, %53, %cst_15 [2] : vector<2x8x8xf32> to vector<2x8xf32>
    %55 = vector.shape_cast %54 : vector<2x8xf32> to vector<2x8x1xf32>
    %56 = tpu.reciprocal %55 {approx = true} : vector<2x8x1xf32> -> vector<2x8x1xf32>
    %57 = vector.broadcast %56 : vector<2x8x1xf32> to vector<2x8x8xf32>
    %58 = arith.mulf %53, %57 : vector<2x8x8xf32>
    %59 = arith.truncf %58 : vector<2x8x8xf32> to vector<2x8x8xbf16>
    "tpu.trace_start"() <{level = 10 : i32, message = "bqk,bkd->bqd"}> : () -> ()
    %cst_16 = arith.constant dense<0.000000e+00> : vector<2x8x8xf32>
    %60 = tpu.matmul %59, %45, %cst_16 {dimension_numbers = #tpu.dot_dimension_numbers<[2], [1], [1], [2], [0, 0, 0, 1, 1, 2], [0], [0]>} : vector<2x8x8xbf16>, vector<2x8x8xbf16>, vector<2x8x8xf32> -> vector<2x8x8xf32>
    "tpu.trace_stop"() : () -> ()
    %61 = vector.shape_cast %60 : vector<2x8x8xf32> to vector<16x8xf32>
    %62 = arith.truncf %61 : vector<16x8xf32> to vector<16x8xbf16>
    %c0_17 = arith.constant 0 : index
    %c8 = arith.constant 8 : index
    %63 = vector.load %arg16[%c0_17, %c8] : memref<16x32xbf16, #tpu.memory_space<vmem>>, vector<16x8xbf16>
    tpu.vector_store %arg16[%c0_17, %c8], %62 {strides = array<i32>} : memref<16x32xbf16, #tpu.memory_space<vmem>>, vector<16x8xbf16>,
    %64 = vector.extract_strided_slice %9 {offsets = [0, 0, 16], sizes = [2, 8, 8], strides = [1, 1, 1]} : vector<2x8x96xbf16> to vector<2x8x8xbf16>
    %65 = vector.extract_strided_slice %9 {offsets = [0, 0, 48], sizes = [2, 8, 8], strides = [1, 1, 1]} : vector<2x8x96xbf16> to vector<2x8x8xbf16>
    %66 = vector.extract_strided_slice %9 {offsets = [0, 0, 80], sizes = [2, 8, 8], strides = [1, 1, 1]} : vector<2x8x96xbf16> to vector<2x8x8xbf16>
    "tpu.trace_start"() <{level = 10 : i32, message = "bqd,bkd->bqk"}> : () -> ()
    %cst_18 = arith.constant dense<0.000000e+00> : vector<2x8x8xf32>
    %67 = tpu.matmul %64, %65, %cst_18 {dimension_numbers = #tpu.dot_dimension_numbers<[2], [2], [1], [1], [0, 0, 0, 1, 1, 1], [0], [0]>} : vector<2x8x8xbf16>, vector<2x8x8xbf16>, vector<2x8x8xf32> -> vector<2x8x8xf32>
    %cst_19 = arith.constant -1.000000e+06 : f32
    "tpu.trace_stop"() : () -> ()
    %68 = vector.broadcast %cst_19 : f32 to vector<2x8x8xf32>
    %69 = arith.select %21, %67, %68 : vector<2x8x8xi1>, vector<2x8x8xf32>
    %cst_20 = arith.constant dense<0xFF800000> : vector<2x8xf32>
    %70 = vector.multi_reduction <maximumf>, %69, %cst_20 [2] : vector<2x8x8xf32> to vector<2x8xf32>
    %71 = vector.shape_cast %70 : vector<2x8xf32> to vector<2x8x1xf32>
    %72 = vector.broadcast %71 : vector<2x8x1xf32> to vector<2x8x8xf32>
    %73 = arith.subf %69, %72 : vector<2x8x8xf32>
    %74 = math.exp %73 : vector<2x8x8xf32>
    %cst_21 = arith.constant dense<0.000000e+00> : vector<2x8xf32>
    %75 = vector.multi_reduction <add>, %74, %cst_21 [2] : vector<2x8x8xf32> to vector<2x8xf32>
    %76 = vector.shape_cast %75 : vector<2x8xf32> to vector<2x8x1xf32>
    %77 = tpu.reciprocal %76 {approx = true} : vector<2x8x1xf32> -> vector<2x8x1xf32>
    %78 = vector.broadcast %77 : vector<2x8x1xf32> to vector<2x8x8xf32>
    %79 = arith.mulf %74, %78 : vector<2x8x8xf32>
    %80 = arith.truncf %79 : vector<2x8x8xf32> to vector<2x8x8xbf16>
    "tpu.trace_start"() <{level = 10 : i32, message = "bqk,bkd->bqd"}> : () -> ()
    %cst_22 = arith.constant dense<0.000000e+00> : vector<2x8x8xf32>
    %81 = tpu.matmul %80, %66, %cst_22 {dimension_numbers = #tpu.dot_dimension_numbers<[2], [1], [1], [2], [0, 0, 0, 1, 1, 2], [0], [0]>} : vector<2x8x8xbf16>, vector<2x8x8xbf16>, vector<2x8x8xf32> -> vector<2x8x8xf32>
    "tpu.trace_stop"() : () -> ()
    %82 = vector.shape_cast %81 : vector<2x8x8xf32> to vector<16x8xf32>
    %83 = arith.truncf %82 : vector<16x8xf32> to vector<16x8xbf16>
    %c0_23 = arith.constant 0 : index
    %c16 = arith.constant 16 : index
    %84 = vector.load %arg16[%c0_23, %c16] : memref<16x32xbf16, #tpu.memory_space<vmem>>, vector<16x8xbf16>
    tpu.vector_store %arg16[%c0_23, %c16], %83 {strides = array<i32>} : memref<16x32xbf16, #tpu.memory_space<vmem>>, vector<16x8xbf16>,
    %85 = vector.extract_strided_slice %9 {offsets = [0, 0, 24], sizes = [2, 8, 8], strides = [1, 1, 1]} : vector<2x8x96xbf16> to vector<2x8x8xbf16>
    %86 = vector.extract_strided_slice %9 {offsets = [0, 0, 56], sizes = [2, 8, 8], strides = [1, 1, 1]} : vector<2x8x96xbf16> to vector<2x8x8xbf16>
    %87 = vector.extract_strided_slice %9 {offsets = [0, 0, 88], sizes = [2, 8, 8], strides = [1, 1, 1]} : vector<2x8x96xbf16> to vector<2x8x8xbf16>
    "tpu.trace_start"() <{level = 10 : i32, message = "bqd,bkd->bqk"}> : () -> ()
    %cst_24 = arith.constant dense<0.000000e+00> : vector<2x8x8xf32>
    %88 = tpu.matmul %85, %86, %cst_24 {dimension_numbers = #tpu.dot_dimension_numbers<[2], [2], [1], [1], [0, 0, 0, 1, 1, 1], [0], [0]>} : vector<2x8x8xbf16>, vector<2x8x8xbf16>, vector<2x8x8xf32> -> vector<2x8x8xf32>
    %cst_25 = arith.constant -1.000000e+06 : f32
    "tpu.trace_stop"() : () -> ()
    %89 = vector.broadcast %cst_25 : f32 to vector<2x8x8xf32>
    %90 = arith.select %21, %88, %89 : vector<2x8x8xi1>, vector<2x8x8xf32>
    %cst_26 = arith.constant dense<0xFF800000> : vector<2x8xf32>
    %91 = vector.multi_reduction <maximumf>, %90, %cst_26 [2] : vector<2x8x8xf32> to vector<2x8xf32>
    %92 = vector.shape_cast %91 : vector<2x8xf32> to vector<2x8x1xf32>
    %93 = vector.broadcast %92 : vector<2x8x1xf32> to vector<2x8x8xf32>
    %94 = arith.subf %90, %93 : vector<2x8x8xf32>
    %95 = math.exp %94 : vector<2x8x8xf32>
    %cst_27 = arith.constant dense<0.000000e+00> : vector<2x8xf32>
    %96 = vector.multi_reduction <add>, %95, %cst_27 [2] : vector<2x8x8xf32> to vector<2x8xf32>
    %97 = vector.shape_cast %96 : vector<2x8xf32> to vector<2x8x1xf32>
    %98 = tpu.reciprocal %97 {approx = true} : vector<2x8x1xf32> -> vector<2x8x1xf32>
    %99 = vector.broadcast %98 : vector<2x8x1xf32> to vector<2x8x8xf32>
    %100 = arith.mulf %95, %99 : vector<2x8x8xf32>
    %101 = arith.truncf %100 : vector<2x8x8xf32> to vector<2x8x8xbf16>
    "tpu.trace_start"() <{level = 10 : i32, message = "bqk,bkd->bqd"}> : () -> ()
    %cst_28 = arith.constant dense<0.000000e+00> : vector<2x8x8xf32>
    %102 = tpu.matmul %101, %87, %cst_28 {dimension_numbers = #tpu.dot_dimension_numbers<[2], [1], [1], [2], [0, 0, 0, 1, 1, 2], [0], [0]>} : vector<2x8x8xbf16>, vector<2x8x8xbf16>, vector<2x8x8xf32> -> vector<2x8x8xf32>
    "tpu.trace_stop"() : () -> ()
    %103 = vector.shape_cast %102 : vector<2x8x8xf32> to vector<16x8xf32>
    %104 = arith.truncf %103 : vector<16x8xf32> to vector<16x8xbf16>
    %c0_29 = arith.constant 0 : index
    %c24 = arith.constant 24 : index
    %105 = vector.load %arg16[%c0_29, %c24] : memref<16x32xbf16, #tpu.memory_space<vmem>>, vector<16x8xbf16>
    tpu.vector_store %arg16[%c0_29, %c24], %104 {strides = array<i32>} : memref<16x32xbf16, #tpu.memory_space<vmem>>, vector<16x8xbf16>,
    %c0_30 = arith.constant 0 : index
    %c0_31 = arith.constant 0 : index
    %106 = vector.load %arg16[%c0_30, %c0_31] : memref<16x32xbf16, #tpu.memory_space<vmem>>, vector<16x32xbf16>
    %c0_32 = arith.constant 0 : index
    %c0_33 = arith.constant 0 : index
    %107 = vector.load %arg5[%c0_32, %c0_33] : memref<32x32xbf16, #tpu.memory_space<vmem>>, vector<32x32xbf16>
    %cst_34 = arith.constant dense<0.000000e+00> : vector<16x32xf32>
    %108 = tpu.matmul %106, %107, %cst_34 {dimension_numbers = #tpu.dot_dimension_numbers<[1], [0], [0], [1], [0, 0, 1, 1], [], []>} : vector<16x32xbf16>, vector<32x32xbf16>, vector<16x32xf32> -> vector<16x32xf32>
    %c0_35 = arith.constant 0 : index
    %c0_36 = arith.constant 0 : index
    %109 = vector.load %arg6[%c0_35, %c0_36] : memref<1x32xf32, #tpu.memory_space<vmem>>, vector<1x32xf32>
    %110 = vector.broadcast %109 : vector<1x32xf32> to vector<16x32xf32>
    %111 = arith.addf %108, %110 : vector<16x32xf32>
    %112 = arith.addf %1, %111 : vector<16x32xf32>
    %c0_37 = arith.constant 0 : index
    %c0_38 = arith.constant 0 : index
    %113 = vector.load %arg7[%c0_37, %c0_38] : memref<1x32xf32, #tpu.memory_space<vmem>>, vector<1x32xf32>
    %c0_39 = arith.constant 0 : index
    %c0_40 = arith.constant 0 : index
    %114 = vector.load %arg8[%c0_39, %c0_40] : memref<1x32xf32, #tpu.memory_space<vmem>>, vector<1x32xf32>
    %cst_41 = arith.constant dense<0.000000e+00> : vector<16xf32>
    %115 = vector.multi_reduction <add>, %112, %cst_41 [1] : vector<16x32xf32> to vector<16xf32>
    %116 = vector.shape_cast %115 : vector<16xf32> to vector<16x1xf32>
    %cst_42 = arith.constant 3.200000e+01 : f32
    %117 = vector.broadcast %cst_42 : f32 to vector<16x1xf32>
    %118 = arith.divf %116, %117 : vector<16x1xf32>
    %119 = vector.broadcast %118 : vector<16x1xf32> to vector<16x32xf32>
    %120 = arith.subf %112, %119 : vector<16x32xf32>
    %121 = arith.mulf %120, %120 : vector<16x32xf32>
    %cst_43 = arith.constant dense<0.000000e+00> : vector<16xf32>
    %122 = vector.multi_reduction <add>, %121, %cst_43 [1] : vector<16x32xf32> to vector<16xf32>
    %123 = vector.shape_cast %122 : vector<16xf32> to vector<16x1xf32>
    %cst_44 = arith.constant 3.200000e+01 : f32
    %124 = vector.broadcast %cst_44 : f32 to vector<16x1xf32>
    %125 = arith.divf %123, %124 : vector<16x1xf32>
    %126 = vector.broadcast %118 : vector<16x1xf32> to vector<16x32xf32>
    %127 = arith.subf %112, %126 : vector<16x32xf32>
    %cst_45 = arith.constant 9.99999974E-6 : f32
    %128 = vector.broadcast %cst_45 : f32 to vector<16x1xf32>
    %129 = arith.addf %125, %128 : vector<16x1xf32>
    %130 = math.rsqrt %129 : vector<16x1xf32>
    %131 = vector.broadcast %130 : vector<16x1xf32> to vector<16x32xf32>
    %132 = arith.mulf %127, %131 : vector<16x32xf32>
    %133 = vector.broadcast %113 : vector<1x32xf32> to vector<16x32xf32>
    %134 = arith.mulf %132, %133 : vector<16x32xf32>
    %135 = vector.broadcast %114 : vector<1x32xf32> to vector<16x32xf32>
    %136 = arith.addf %134, %135 : vector<16x32xf32>
    %137 = arith.truncf %136 : vector<16x32xf32> to vector<16x32xbf16>
    %c0_46 = arith.constant 0 : index
    %c0_47 = arith.constant 0 : index
    %138 = vector.load %arg9[%c0_46, %c0_47] : memref<32x64xbf16, #tpu.memory_space<vmem>>, vector<32x64xbf16>
    %cst_48 = arith.constant dense<0.000000e+00> : vector<16x64xf32>
    %139 = tpu.matmul %137, %138, %cst_48 {dimension_numbers = #tpu.dot_dimension_numbers<[1], [0], [0], [1], [0, 0, 1, 1], [], []>} : vector<16x32xbf16>, vector<32x64xbf16>, vector<16x64xf32> -> vector<16x64xf32>
    %c0_49 = arith.constant 0 : index
    %c0_50 = arith.constant 0 : index
    %140 = vector.load %arg10[%c0_49, %c0_50] : memref<1x64xf32, #tpu.memory_space<vmem>>, vector<1x64xf32>
    %141 = vector.broadcast %140 : vector<1x64xf32> to vector<16x64xf32>
    %142 = arith.addf %139, %141 : vector<16x64xf32>
    %cst_51 = arith.constant 0.000000e+00 : f32
    %143 = vector.broadcast %cst_51 : f32 to vector<16x64xf32>
    %144 = arith.maximumf %142, %143 : vector<16x64xf32>
    %145 = arith.truncf %144 : vector<16x64xf32> to vector<16x64xbf16>
    %c0_52 = arith.constant 0 : index
    %c0_53 = arith.constant 0 : index
    %146 = vector.load %arg11[%c0_52, %c0_53] : memref<64x32xbf16, #tpu.memory_space<vmem>>, vector<64x32xbf16>
    %cst_54 = arith.constant dense<0.000000e+00> : vector<16x32xf32>
    %147 = tpu.matmul %145, %146, %cst_54 {dimension_numbers = #tpu.dot_dimension_numbers<[1], [0], [0], [1], [0, 0, 1, 1], [], []>} : vector<16x64xbf16>, vector<64x32xbf16>, vector<16x32xf32> -> vector<16x32xf32>
    %c0_55 = arith.constant 0 : index
    %c0_56 = arith.constant 0 : index
    %148 = vector.load %arg12[%c0_55, %c0_56] : memref<1x32xf32, #tpu.memory_space<vmem>>, vector<1x32xf32>
    %149 = vector.broadcast %148 : vector<1x32xf32> to vector<16x32xf32>
    %150 = arith.addf %147, %149 : vector<16x32xf32>
    %151 = arith.addf %136, %150 : vector<16x32xf32>
    %c0_57 = arith.constant 0 : index
    %c0_58 = arith.constant 0 : index
    %152 = vector.load %arg13[%c0_57, %c0_58] : memref<1x32xf32, #tpu.memory_space<vmem>>, vector<1x32xf32>
    %c0_59 = arith.constant 0 : index
    %c0_60 = arith.constant 0 : index
    %153 = vector.load %arg14[%c0_59, %c0_60] : memref<1x32xf32, #tpu.memory_space<vmem>>, vector<1x32xf32>
    %cst_61 = arith.constant dense<0.000000e+00> : vector<16xf32>
    %154 = vector.multi_reduction <add>, %151, %cst_61 [1] : vector<16x32xf32> to vector<16xf32>
    %155 = vector.shape_cast %154 : vector<16xf32> to vector<16x1xf32>
    %cst_62 = arith.constant 3.200000e+01 : f32
    %156 = vector.broadcast %cst_62 : f32 to vector<16x1xf32>
    %157 = arith.divf %155, %156 : vector<16x1xf32>
    %158 = vector.broadcast %157 : vector<16x1xf32> to vector<16x32xf32>
    %159 = arith.subf %151, %158 : vector<16x32xf32>
    %160 = arith.mulf %159, %159 : vector<16x32xf32>
    %cst_63 = arith.constant dense<0.000000e+00> : vector<16xf32>
    %161 = vector.multi_reduction <add>, %160, %cst_63 [1] : vector<16x32xf32> to vector<16xf32>
    %162 = vector.shape_cast %161 : vector<16xf32> to vector<16x1xf32>
    %cst_64 = arith.constant 3.200000e+01 : f32
    %163 = vector.broadcast %cst_64 : f32 to vector<16x1xf32>
    %164 = arith.divf %162, %163 : vector<16x1xf32>
    %165 = vector.broadcast %157 : vector<16x1xf32> to vector<16x32xf32>
    %166 = arith.subf %151, %165 : vector<16x32xf32>
    %cst_65 = arith.constant 9.99999974E-6 : f32
    %167 = vector.broadcast %cst_65 : f32 to vector<16x1xf32>
    %168 = arith.addf %164, %167 : vector<16x1xf32>
    %169 = math.rsqrt %168 : vector<16x1xf32>
    %170 = vector.broadcast %169 : vector<16x1xf32> to vector<16x32xf32>
    %171 = arith.mulf %166, %170 : vector<16x32xf32>
    %172 = vector.broadcast %152 : vector<1x32xf32> to vector<16x32xf32>
    %173 = arith.mulf %171, %172 : vector<16x32xf32>
    %174 = vector.broadcast %153 : vector<1x32xf32> to vector<16x32xf32>
    %175 = arith.addf %173, %174 : vector<16x32xf32>
    %c0_66 = arith.constant 0 : index
    %c0_67 = arith.constant 0 : index
    %176 = vector.load %arg15[%c0_66, %c0_67] : memref<16x32xf32, #tpu.memory_space<vmem>>, vector<16x32xf32>
    tpu.vector_store %arg15[%c0_66, %c0_67], %175 {strides = array<i32>} : memref<16x32xf32, #tpu.memory_space<vmem>>, vector<16x32xf32>,
    return
  }
  func.func @transform_0(%arg0: i32) -> i32 {
    %c0_i32 = arith.constant 0 : i32
    %c0_i32_0 = arith.constant 0 : i32
    return %c0_i32 : i32
  }
  func.func @transform_1(%arg0: i32) -> (i32, i32) {
    %c0_i32 = arith.constant 0 : i32
    %c0_i32_0 = arith.constant 0 : i32
    return %arg0, %c0_i32 : i32, i32
  }
  func.func @transform_2(%arg0: i32) -> (i32, i32) {
    %c0_i32 = arith.constant 0 : i32
    %c0_i32_0 = arith.constant 0 : i32
    %c0_i32_1 = arith.constant 0 : i32
    return %c0_i32, %c0_i32_0 : i32, i32
  }
  func.func @transform_3(%arg0: i32) -> (i32, i32) {
    %c0_i32 = arith.constant 0 : i32
    %c0_i32_0 = arith.constant 0 : i32
    %c0_i32_1 = arith.constant 0 : i32
    return %c0_i32, %c0_i32_0 : i32, i32
  }
  func.func @transform_4(%arg0: i32) -> (i32, i32) {
    %c0_i32 = arith.constant 0 : i32
    %c0_i32_0 = arith.constant 0 : i32
    %c0_i32_1 = arith.constant 0 : i32
    return %c0_i32, %c0_i32_0 : i32, i32
  }
  func.func @transform_5(%arg0: i32) -> (i32, i32) {
    %c0_i32 = arith.constant 0 : i32
    %c0_i32_0 = arith.constant 0 : i32
    %c0_i32_1 = arith.constant 0 : i32
    return %c0_i32, %c0_i32_0 : i32, i32
  }
  func.func @transform_6(%arg0: i32) -> (i32, i32) {
    %c0_i32 = arith.constant 0 : i32
    %c0_i32_0 = arith.constant 0 : i32
    %c0_i32_1 = arith.constant 0 : i32
    return %c0_i32, %c0_i32_0 : i32, i32
  }
  func.func @transform_7(%arg0: i32) -> (i32, i32) {
    %c0_i32 = arith.constant 0 : i32
    %c0_i32_0 = arith.constant 0 : i32
    %c0_i32_1 = arith.constant 0 : i32
    return %c0_i32, %c0_i32_0 : i32, i32
  }
  func.func @transform_8(%arg0: i32) -> (i32, i32) {
    %c0_i32 = arith.constant 0 : i32
    %c0_i32_0 = arith.constant 0 : i32
    %c0_i32_1 = arith.constant 0 : i32
    return %c0_i32, %c0_i32_0 : i32, i32
  }
  func.func @transform_9(%arg0: i32) -> (i32, i32) {
    %c0_i32 = arith.constant 0 : i32
    %c0_i32_0 = arith.constant 0 : i32
    %c0_i32_1 = arith.constant 0 : i32
    return %c0_i32, %c0_i32_0 : i32, i32
  }
  func.func @transform_10(%arg0: i32) -> (i32, i32) {
    %c0_i32 = arith.constant 0 : i32
    %c0_i32_0 = arith.constant 0 : i32
    %c0_i32_1 = arith.constant 0 : i32
    return %c0_i32, %c0_i32_0 : i32, i32
  }
  func.func @transform_11(%arg0: i32) -> (i32, i32) {
    %c0_i32 = arith.constant 0 : i32
    %c0_i32_0 = arith.constant 0 : i32
    %c0_i32_1 = arith.constant 0 : i32
    return %c0_i32, %c0_i32_0 : i32, i32
  }
  func.func @transform_12(%arg0: i32) -> (i32, i32) {
    %c0_i32 = arith.constant 0 : i32
    %c0_i32_0 = arith.constant 0 : i32
    %c0_i32_1 = arith.constant 0 : i32
    return %c0_i32, %c0_i32_0 : i32, i32
  }
  func.func @transform_13(%arg0: i32) -> (i32, i32) {
    %c0_i32 = arith.constant 0 : i32
    %c0_i32_0 = arith.constant 0 : i32
    %c0_i32_1 = arith.constant 0 : i32
    return %c0_i32, %c0_i32_0 : i32, i32
  }
  func.func @transform_14(%arg0: i32) -> (i32, i32) {
    %c0_i32 = arith.constant 0 : i32
    %c0_i32_0 = arith.constant 0 : i32
    return %arg0, %c0_i32 : i32, i32
  }
}

</mosaic_0001>

<bundles_post_ra>
// kernel: tpu_custom_call.1
= control target key start
LH: loop header
LB: loop body
LE: loop exit
PB: predicated region body
PF: predicated region fallthrough
CT: control target
= control target key end

     0   :  { %19 = vsyncpa [#allocation6], 0  ;;  %s1448_s0 = inlined_call_operand.vmem [shape: s32[2], index: 0, kind: input, shape index: {}]   ;;  %s1449_s1 = inlined_call_operand.hbm [shape: f32[16,32], index: 1, kind: input, shape index: {}, may-alias: {1,14}]   ;;  %s1450_s2 = inlined_call_operand.vmem [shape: bf16[32,96], index: 2, kind: input, shape index: {}]   ;;  %s1451_s3 = inlined_call_operand.vmem [shape: f32[1,96], index: 3, kind: input, shape index: {}]   ;;  %s1452_s4 = inlined_call_operand.vmem [shape: bf16[32,32], index: 4, kind: input, shape index: {}]   ;;  %s1453_s5 = inlined_call_operand.vmem [shape: f32[1,32], index: 5, kind: input, shape index: {}]   ;;  %s1454_s6 = inlined_call_operand.vmem [shape: f32[1,32], index: 6, kind: input, shape index: {}]   ;;  %s1455_s7 = inlined_call_operand.vmem [shape: f32[1,32], index: 7, kind: input, shape index: {}]   ;;  %s1456_s8 = inlined_call_operand.vmem [shape: bf16[32,64], index: 8, kind: input, shape index: {}]   ;;  %s1457_s9 = inlined_call_operand.vmem [shape: f32[1,64], index: 9, kind: input, shape index: {}]   ;;  %s1458_s10 = inlined_call_operand.vmem [shape: bf16[64,32], index: 10, kind: input, shape index: {}]   ;;  %s1459_s11 = inlined_call_operand.vmem [shape: f32[1,32], index: 11, kind: input, shape index: {}]   ;;  %s1460_s12 = inlined_call_operand.vmem [shape: f32[1,32], index: 12, kind: input, shape index: {}]   ;;  %s1461_s13 = inlined_call_operand.vmem [shape: f32[1,32], index: 13, kind: input, shape index: {}]   ;;  %s1462_s14 = inlined_call_operand.hbm [shape: f32[16,32], index: 14, kind: output, shape index: {}, may-alias: {1,14}]  }
   0x1   :  { %20 = vsyncpa [#allocation4], 0 }
   0x2   :  { %21 = vsyncpa [#allocation5], 0  ;;  %s27_s15 = sshll.u32 %s1448_s0, 4  ;;  %s35_s18 = sshll.u32 %s1449_s1, 4  ;;  %s28_s15 = int_to_ptr.vmem [resolvable:$true] %s27_s15  ;;  %s36_s18 = int_to_ptr.hbm [resolvable:$true] %s35_s18 }
   0x3   :  { %s1130_s19 = smov [#allocation3]   ;;  %s1131_s20 = smov [#allocation7]  }
   0x4   :  { %30 = dma.vmem_to_smem %s28_s15, 16, %s1130_s19, [#allocation6]  }
   0x5   :  { %s37_s21 = sshll.u32 %s1131_s20, 4  ;;  %s1132_s22 = smov 128   ;;  %s38_s21 = int_to_ptr.vmem [resolvable:$true] %s37_s21 }
   0x6   :  { %s1133_s23 = smov 8  }
   0x7   :  { %43 = dma.hbm_to_vmem [thread:$0]  %s36_s18, 256, %s38_s21, [#allocation4], %s1132_s22, %s1132_s22, %s1133_s23  }
   0x8   :  { %1124 = dma.done.wait [#allocation6], 16  }
   0x9   :  { %1125 = vsyncadd [#allocation6], 4294967280 }
   0xa   :  { %1126 = dma.done.wait [#allocation4], 256  }
   0xb   :  { %1127 = vsyncadd [#allocation4], 4294967040 }
   0xc   :  { %76 = sfence }
   0xd   :  { %v985_v0 = vld [vmem:[%s1450_s2 + $0x8] sm:$0xff]  ;;  %v984_v1 = vld [vmem:[%s1450_s2] sm:$0xff]  ;;  %v1241_v3 = vld [vmem:[#allocation7 + $0x8] sm:$0xff]  ;;  %vm102_vm0 = vcmask 261120   ;;  %s1134_s2 = smov 120   ;;  %s1135_s28 = smov 88   ;;  %v125_v38 = vlaneseq }
   0xe   :  { %v1239_v2 = vld [vmem:[#allocation7] sm:$0xff]  ;;  %112 = vmatpush.bf16.msra.mxu0 %v985_v0  ;;  %v1014_v5 = vld [vmem:[%s1451_s3] ss:$0 sm:$0xff]  ;;  %s1136_s29 = smov 96   ;;  %s1137_s3 = smov 112   ;;  %vm136_vm1 = vcmask 64512  }
   0xf   :  { %v81_v4 = vpack.c.bf16 %v1241_v3, %v1239_v2  ;;  %s1138_s30 = smov 80   ;;  %s1139_s15 = smov 72   ;;  %v126_v39 = vand.u32 127, %v125_v38  ;;  %vm211_vm4 = vcmask 1043456   ;;  %vm251_vm5 = vcmask 60416  }
  0x10   :  { %s1140_s16 = smov 104   ;;  %s122_s17 = sld [smem:[#allocation3]]  ;;  %vm378_vm6 = vcmask 126016   ;;  %vm505_vm7 = vcmask 191616   ;;  %vm632_vm8 = vcmask 257216  }
  0x11   :  { %s928_s18 = sld [smem:[#allocation3 + $0x1]]  ;;  %s1141_s19 = smov 64  }
  0x12   :  { %113 = vmatpush.bf16.msra.mxu0 %v984_v1  ;;  %s1142_s20 = smov 56   ;;  %s1143_s21 = smov 48  }
  0x13   :  { %s1144_s0 = smov 40   ;;  %s1145_s24 = smov 16  }
  0x14   :  { %s1146_s1 = smov 24  }
  0x15   :  { %927 = vmatmul.msk.bf16.vlgmr.msra.gmra.mxu0 %vm102_vm0, %v81_v4 }
  0x16   :  { %v127_v40 = vstv %s122_s17 }
  0x17   :  { %vm1283_vm2 = vcmp.lt.s32.totalorder %v126_v39, %v127_v40  ;;  %v128_v50 = vstv %s928_s18 }
  0x18   :  { %vm1293_vm3 = vcmp.lt.s32.totalorder %v126_v39, %v128_v50 }
  0x92   :  { %v115_v6 = vpop.f32.mrf.mxu0 }
  0x93   :  { %v116_v7 = vadd.f32 %v1014_v5, %v115_v6 }
  0x95   :  { %v120_v8 = vpack.c.bf16 %v116_v7, %v116_v7 }
  0x97   :  { %v132_v9 = vunpack.c.l.b16 %v120_v8 }
  0x99   :  { %v1249_v10 = vpack.c.b16 %v132_v9, %v132_v9 }
  0x9a   :  { %v117_v11 = vpop.f32.mrf.mxu0 }
  0x9b   :  { %v118_v12 = vadd.f32 %v1014_v5, %v117_v11  ;;  %254 = vrot.lane.b32.xlu2 %v1249_v10, %s1134_s2  ;;  %256 = vrot.lane.b32.xlu1 %v1249_v10, %s1135_s28 }
  0x9c   :  { %134 = vrot.lane.b32.xlu0 %v1249_v10, %s1136_s29 }
  0x9d   :  { %v121_v13 = vpack.c.bf16 %v118_v12, %v118_v12 }
  0x9f   :  { %v157_v14 = vunpack.c.l.b16 %v121_v13 }
  0xa1   :  { %v1254_v15 = vpack.c.b16 %v157_v14, %v157_v14 }
  0xa3   :  { %277 = vrot.lane.b32.xlu2 %v1254_v15, %s1134_s2  ;;  %279 = vrot.lane.b32.xlu1 %v1254_v15, %s1135_s28 }
  0xa4   :  { %159 = vrot.lane.b32.xlu0 %v1254_v15, %s1136_s29 }
  0xab   :  { %381 = vrot.lane.b32.xlu2 %v1249_v10, %s1137_s3  ;;  %406 = vrot.lane.b32.xlu1 %v1254_v15, %s1138_s30 }
  0xac   :  { %383 = vrot.lane.b32.xlu0 %v1249_v10, %s1138_s30 }
  0xb3   :  { %533 = vrot.lane.b32.xlu2 %v1254_v15, %s1139_s15  ;;  %510 = vrot.lane.b32.xlu1 %v1249_v10, %s1139_s15 }
  0xb4   :  { %404 = vrot.lane.b32.xlu0 %v1254_v15, %s1137_s3 }
  0xbb   :  { %531 = vrot.lane.b32.xlu1 %v1254_v15, %s1140_s16 }
  0xbc   :  { %508 = vrot.lane.b32.xlu0 %v1249_v10, %s1140_s16 }
  0xf5   :  { %v255_v16 = vpop.permute.xlu2 %254 }
  0xfd   :  { %v278_v21 = vpop.permute.xlu2 %277 }
 0x105   :  { %v382_v26 = vpop.permute.xlu2 %381 }
 0x10d   :  { %v257_v17 = vpop.permute.xlu1 %256  ;;  %v534_v31 = vpop.permute.xlu2 %533 }
 0x10e   :  { %v135_v18 = vpop.permute.xlu0 %134  ;;  %v262_v19 = vsel %vm136_vm1, %v257_v17, 0  ;;  %v539_v34 = vsel %vm136_vm1, %v534_v31, 0 }
 0x10f   :  { %v141_v20 = vsel %vm136_vm1, %v135_v18, 0  ;;  %271 = vmatpush.bf16.xpose.msrb.mxu0 %v262_v19 }
 0x110   :  { %150 = vmatpush.bf16.xpose.msra.mxu1 %v141_v20 }
 0x115   :  { %v280_v22 = vpop.permute.xlu1 %279 }
 0x116   :  { %v160_v23 = vpop.permute.xlu0 %159  ;;  %933 = vmatmul.msk.bf16.vlgmr.msrb.gmra.mxu0 %vm136_vm1, %v255_v16  ;;  %v285_v24 = vsel %vm136_vm1, %v280_v22, 0 }
 0x117   :  { %929 = vmatmul.msk.bf16.vlgmr.msra.gmra.mxu1 %vm136_vm1, %v120_v8  ;;  %v165_v25 = vsel %vm136_vm1, %v160_v23, 0 }
 0x118   :  { %174 = vmatpush.bf16.xpose.msra.mxu2 %v165_v25  ;;  %294 = vmatpush.bf16.xpose.msrb.mxu1 %v285_v24 }
 0x11d   :  { %v407_v27 = vpop.permute.xlu1 %406 }
 0x11e   :  { %v412_v28 = vsel %vm136_vm1, %v407_v27, 0  ;;  %v384_v29 = vpop.permute.xlu0 %383 }
 0x11f   :  { %v389_v30 = vsel %vm136_vm1, %v384_v29, 0  ;;  %930 = vmatmul.msk.bf16.vlgmr.msra.gmra.mxu2 %vm136_vm1, %v121_v13 }
 0x120   :  { %421 = vmatpush.bf16.xpose.msra.mxu1 %v412_v28  ;;  %398 = vmatpush.bf16.xpose.msra.mxu0 %v389_v30 }
 0x125   :  { %v511_v32 = vpop.permute.xlu1 %510 }
 0x126   :  { %v516_v33 = vsel %vm136_vm1, %v511_v32, 0  ;;  %v405_v35 = vpop.permute.xlu0 %404 }
 0x127   :  { %934 = vmatmul.msk.bf16.vlgmr.msrb.gmra.mxu1 %vm136_vm1, %v278_v21  ;;  %937 = vmatmul.msk.bf16.vlgmr.msra.gmra.mxu0 %vm136_vm1, %v382_v26 }
 0x128   :  { %548 = vmatpush.bf16.xpose.msrb.mxu1 %v539_v34  ;;  %525 = vmatpush.bf16.xpose.msrb.mxu0 %v516_v33 }
 0x12d   :  { %v532_v37 = vpop.permute.xlu1 %531 }
 0x12e   :  { %v509_v36 = vpop.permute.xlu0 %508 }
 0x137   :  { %938 = vmatmul.msk.bf16.vlgmr.msra.gmra.mxu1 %vm136_vm1, %v405_v35  ;;  %941 = vmatmul.msk.bf16.vlgmr.msrb.gmra.mxu0 %vm136_vm1, %v509_v36 }
 0x147   :  { %942 = vmatmul.msk.bf16.vlgmr.msrb.gmra.mxu1 %vm136_vm1, %v532_v37 }
 0x193   :  { %v273_v42 = vpop.f32.mrf.mxu0 }
 0x194   :  { %v152_v43 = vpop.f32.mrf.mxu1  ;;  %v300_v44 = vsel %vm1283_vm2, %v273_v42, -1000000.0 }
 0x195   :  { %v180_v45 = vsel %vm1283_vm2, %v152_v43, -1000000.0  ;;  %v302_v46 = vsel %vm136_vm1, %v300_v44, -inf }
 0x196   :  { %303 = vmax.xlane.f32.xlu1 %v302_v46  ;;  %v182_v47 = vsel %vm136_vm1, %v180_v45, -inf }
 0x197   :  { %183 = vmax.xlane.f32.xlu2 %v182_v47 }
 0x19b   :  { %v275_v48 = vpop.f32.mrf.mxu0 }
 0x19c   :  { %v154_v49 = vpop.f32.mrf.mxu1 }
 0x1a2   :  { %v176_v52 = vpop.f32.mrf.mxu2 }
 0x1a3   :  { %v181_v53 = vsel %vm1293_vm3, %v176_v52, -1000000.0 }
 0x1a4   :  { %v296_v54 = vpop.f32.mrf.mxu1  ;;  %v400_v55 = vpop.f32.mrf.mxu0  ;;  %v185_v56 = vsel %vm136_vm1, %v181_v53, -inf }
 0x1a5   :  { %v301_v57 = vsel %vm1293_vm3, %v296_v54, -1000000.0  ;;  %v1304_v58 = vsel %vm1283_vm2, %v400_v55, -1000000.0  ;;  %186 = vmax.xlane.f32.xlu0 %v185_v56 }
 0x1a6   :  { %v305_v59 = vsel %vm136_vm1, %v301_v57, -inf  ;;  %v429_v13 = vsel %vm136_vm1, %v1304_v58, -inf }
 0x1a7   :  { %306 = vmax.xlane.f32.xlu2 %v305_v59 }
 0x1aa   :  { %v178_v60 = vpop.f32.mrf.mxu2 }
 0x1ac   :  { %v298_v61 = vpop.f32.mrf.mxu1  ;;  %v402_v62 = vpop.f32.mrf.mxu0 }
 0x1af   :  { %228 = vrot.lane.b32.xlu1 %v1254_v15, %s1141_s19 }
 0x1b4   :  { %v423_v63 = vpop.f32.mrf.mxu1  ;;  %v527_v0 = vpop.f32.mrf.mxu0 }
 0x1b5   :  { %v428_v8 = vsel %vm1293_vm3, %v423_v63, -1000000.0  ;;  %v554_v12 = vsel %vm1283_vm2, %v527_v0, -1000000.0 }
 0x1b6   :  { %v432_v11 = vsel %vm136_vm1, %v428_v8, -inf  ;;  %v556_v14 = vsel %vm136_vm1, %v554_v12, -inf }
 0x1b7   :  { %347 = vrot.lane.b32.xlu1 %v1254_v15, %s1142_s20 }
 0x1b9   :  { %326 = vrot.lane.b32.xlu0 %v1249_v10, %s1142_s20 }
 0x1bc   :  { %v425_v1 = vpop.f32.mrf.mxu1  ;;  %v529_v4 = vpop.f32.mrf.mxu0 }
 0x1bf   :  { %206 = vrot.lane.b32.xlu2 %v1249_v10, %s1141_s19 }
 0x1c4   :  { %v550_v5 = vpop.f32.mrf.mxu1 }
 0x1c5   :  { %v555_v7 = vsel %vm1293_vm3, %v550_v5, -1000000.0 }
 0x1c6   :  { %v559_v9 = vsel %vm136_vm1, %v555_v7, -inf }
 0x1cc   :  { %v552_v6 = vpop.f32.mrf.mxu1 }
 0x1e1   :  { %560 = vmax.xlane.f32.xlu1 %v559_v9 }
 0x1e3   :  { %433 = vmax.xlane.f32.xlu0 %v432_v11 }
 0x1e8   :  { %430 = vmax.xlane.f32.xlu2 %v429_v13 }
 0x1eb   :  { %557 = vmax.xlane.f32.xlu0 %v556_v14 }
 0x209   :  { %v304_v16 = vpop.xlane.xlu1 %303 }
 0x20a   :  { %v308_v17 = vsub.f32 %v300_v44, %v304_v16  ;;  %v184_v18 = vpop.xlane.xlu2 %183 }
 0x20b   :  { %v188_v19 = vsub.f32 %v180_v45, %v184_v18 }
 0x20c   :  { %v310_v20 = vmul.f32 1.442695, %v308_v17 }
 0x20d   :  { %v190_v21 = vmul.f32 1.442695, %v188_v19 }
 0x20e   :  { %1022 = vpow2.f32 %v310_v20 }
 0x20f   :  { %1024 = vpow2.f32 %v190_v21 }
 0x214   :  { %v1322_v22 = vpop.eup %1022 }
 0x215   :  { %v1324_v23 = vpop.eup %1024  ;;  %v314_v24 = vsel %vm136_vm1, %v1322_v22, 0.0 }
 0x216   :  { %v194_v25 = vsel %vm136_vm1, %v1324_v23, 0.0  ;;  %315 = vadd.xlane.f32.xlu0 %v314_v24 }
 0x217   :  { %195 = vadd.xlane.f32.xlu1 %v194_v25 }
 0x218   :  { %v187_v26 = vpop.xlane.xlu0 %186 }
 0x219   :  { %v189_v27 = vsub.f32 %v181_v53, %v187_v26 }
 0x21a   :  { %v307_v28 = vpop.xlane.xlu2 %306 }
 0x21b   :  { %v192_v29 = vmul.f32 1.442695, %v189_v27  ;;  %v309_v30 = vsub.f32 %v301_v57, %v307_v28 }
 0x21d   :  { %1026 = vpow2.f32 %v192_v29  ;;  %v312_v31 = vmul.f32 1.442695, %v309_v30 }
 0x21f   :  { %1028 = vpow2.f32 %v312_v31 }
 0x221   :  { %v229_v32 = vpop.permute.xlu1 %228 }
 0x222   :  { %v207_v33 = vpop.permute.xlu2 %206  ;;  %v234_v34 = vsel %vm211_vm4, %v229_v32, 0 }
 0x223   :  { %v1331_v35 = vpop.eup %1026  ;;  %v213_v36 = vsel %vm211_vm4, %v207_v33, 0 }
 0x224   :  { %222 = vmatpush.bf16.msra.mxu3 %v213_v36  ;;  %v197_v37 = vsel %vm136_vm1, %v1331_v35, 0.0 }
 0x225   :  { %v1336_v38 = vpop.eup %1028  ;;  %198 = vadd.xlane.f32.xlu0 %v197_v37 }
 0x226   :  { %v317_v39 = vsel %vm136_vm1, %v1336_v38, 0.0 }
 0x227   :  { %318 = vadd.xlane.f32.xlu2 %v317_v39 }
 0x228   :  { %243 = vmatpush.bf16.msrb.mxu3 %v234_v34 }
 0x229   :  { %v348_v42 = vpop.permute.xlu1 %347 }
 0x22a   :  { %v353_v9 = vsel %vm211_vm4, %v348_v42, 0 }
 0x22b   :  { %v327_v40 = vpop.permute.xlu0 %326 }
 0x22c   :  { %v332_v41 = vsel %vm211_vm4, %v327_v40, 0 }
 0x22d   :  { %341 = vmatpush.bf16.msrb.mxu2 %v332_v41 }
 0x230   :  { %474 = vrot.lane.b32.xlu1 %v1254_v15, %s1143_s21 }
 0x23f   :  { %453 = vrot.lane.b32.xlu2 %v1249_v10, %s1143_s21 }
 0x254   :  { %v561_v43 = vpop.xlane.xlu1 %560 }
 0x255   :  { %v563_v44 = vsub.f32 %v555_v7, %v561_v43 }
 0x256   :  { %v434_v45 = vpop.xlane.xlu0 %433 }
 0x257   :  { %v436_v46 = vsub.f32 %v428_v8, %v434_v45  ;;  %v566_v48 = vmul.f32 1.442695, %v563_v44 }
 0x259   :  { %v439_v47 = vmul.f32 1.442695, %v436_v46 }
 0x25b   :  { %1030 = vpow2.f32 %v439_v47  ;;  %v431_v49 = vpop.xlane.xlu2 %430 }
 0x25c   :  { %v435_v50 = vsub.f32 %v1304_v58, %v431_v49  ;;  %1032 = vpow2.f32 %v566_v48 }
 0x25e   :  { %v437_v51 = vmul.f32 1.442695, %v435_v50  ;;  %v558_v52 = vpop.xlane.xlu0 %557 }
 0x25f   :  { %v562_v53 = vsub.f32 %v554_v12, %v558_v52 }
 0x260   :  { %1034 = vpow2.f32 %v437_v51 }
 0x261   :  { %v1031_v54 = vpop.eup %1030  ;;  %v564_v55 = vmul.f32 1.442695, %v562_v53 }
 0x262   :  { %v444_v56 = vsel %vm136_vm1, %v1031_v54, 0.0  ;;  %v1345_v57 = vpop.eup %1032 }
 0x263   :  { %1036 = vpow2.f32 %v564_v55  ;;  %445 = vadd.xlane.f32.xlu0 %v444_v56  ;;  %v571_v61 = vsel %vm136_vm1, %v1345_v57, 0.0 }
 0x266   :  { %v1035_v59 = vpop.eup %1034 }
 0x267   :  { %v441_v60 = vsel %vm136_vm1, %v1035_v59, 0.0 }
 0x268   :  { %442 = vadd.xlane.f32.xlu1 %v441_v60  ;;  %572 = vadd.xlane.f32.xlu2 %v571_v61 }
 0x269   :  { %v1037_v58 = vpop.eup %1036 }
 0x26a   :  { %v568_v62 = vsel %vm136_vm1, %v1037_v58, 0.0 }
 0x26b   :  { %569 = vadd.xlane.f32.xlu0 %v568_v62 }
 0x27f   :  { %580 = vrot.lane.b32.xlu0 %v1249_v10, %s1144_s0 }
 0x281   :  { %601 = vrot.lane.b32.xlu1 %v1254_v15, %s1144_s0 }
 0x289   :  { %v316_v63 = vpop.xlane.xlu0 %315 }
 0x28a   :  { %v196_v0 = vpop.xlane.xlu1 %195  ;;  %1038 = vrcp.f32 %v316_v63 }
 0x28b   :  { %1040 = vrcp.f32 %v196_v0 }
 0x290   :  { %v1039_v1 = vpop.eup %1038 }
 0x291   :  { %v1041_v4 = vpop.eup %1040  ;;  %v322_v5 = vmul.f32 %v1039_v1, %v1322_v22 }
 0x292   :  { %v202_v6 = vmul.f32 %v1041_v4, %v1324_v23 }
 0x293   :  { %v324_v7 = vpack.c.bf16 %v322_v5, %v322_v5 }
 0x294   :  { %v204_v8 = vpack.c.bf16 %v202_v6, %v202_v6  ;;  %v988_v6 = vld [vmem:[%s1452_s4 + $0x8] sm:$0xff] }
 0x295   :  { %935 = vmatmul.msk.bf16.vlgmr.msrb.gmra.mxu2 %vm136_vm1, %v324_v7  ;;  %671 = vmatpush.bf16.msra.mxu0 %v988_v6  ;;  %v987_v7 = vld [vmem:[%s1452_s4] sm:$0xff]  ;;  %v994_v6 = vld [vmem:[%s1458_s10 + $0x18] sm:$0xff] }
 0x296   :  { %931 = vmatmul.msk.bf16.vlgmr.msra.gmra.mxu3 %vm136_vm1, %v204_v8 }
 0x297   :  { %362 = vmatpush.bf16.msra.mxu3 %v353_v9 }
 0x298   :  { %v199_v10 = vpop.xlane.xlu0 %198 }
 0x299   :  { %1042 = vrcp.f32 %v199_v10  ;;  %672 = vmatpush.bf16.msra.mxu0 %v987_v7  ;;  %v993_v7 = vld [vmem:[%s1458_s10 + $0x10] sm:$0xff] }
 0x29a   :  { %v319_v15 = vpop.xlane.xlu2 %318 }
 0x29b   :  { %1044 = vrcp.f32 %v319_v15 }
 0x29f   :  { %v1043_v11 = vpop.eup %1042 }
 0x2a0   :  { %v203_v12 = vmul.f32 %v1043_v11, %v1331_v35 }
 0x2a1   :  { %v1045_v19 = vpop.eup %1044 }
 0x2a2   :  { %v454_v13 = vpop.permute.xlu2 %453  ;;  %v475_v16 = vpop.permute.xlu1 %474  ;;  %v205_v17 = vpack.c.bf16 %v203_v12, %v203_v12  ;;  %v323_v20 = vmul.f32 %v1045_v19, %v1336_v38  ;;  %v1015_v12 = vld [vmem:[%s1453_s5] ss:$0 sm:$0xff]  ;;  %s905_s5 = sshll.u32 %s1462_s14, 4  ;;  %s906_s5 = int_to_ptr.hbm [resolvable:$true] %s905_s5 }
 0x2a3   :  { %v459_v14 = vsel %vm211_vm4, %v454_v13, 0  ;;  %v480_v18 = vsel %vm211_vm4, %v475_v16, 0 }
 0x2a4   :  { %468 = vmatpush.bf16.msra.mxu2 %v459_v14  ;;  %v325_v21 = vpack.c.bf16 %v323_v20, %v323_v20 }
 0x2a6   :  { %932 = vmatmul.msk.bf16.vlgmr.msrb.gmra.mxu3 %vm136_vm1, %v205_v17 }
 0x2a7   :  { %489 = vmatpush.bf16.msrb.mxu3 %v480_v18 }
 0x2b6   :  { %936 = vmatmul.msk.bf16.vlgmr.msra.gmra.mxu3 %vm136_vm1, %v325_v21 }
 0x2d6   :  { %v446_v22 = vpop.xlane.xlu0 %445 }
 0x2d7   :  { %1046 = vrcp.f32 %v446_v22  ;;  %v1147_v22 = vmov 32.0  }
 0x2db   :  { %v443_v23 = vpop.xlane.xlu1 %442  ;;  %v573_v29 = vpop.xlane.xlu2 %572 }
 0x2dc   :  { %1048 = vrcp.f32 %v443_v23 }
 0x2dd   :  { %v1047_v24 = vpop.eup %1046  ;;  %1050 = vrcp.f32 %v573_v29 }
 0x2de   :  { %v450_v25 = vmul.f32 %v1047_v24, %v1031_v54  ;;  %v570_v31 = vpop.xlane.xlu0 %569 }
 0x2df   :  { %1052 = vrcp.f32 %v570_v31 }
 0x2e0   :  { %v452_v26 = vpack.c.bf16 %v450_v25, %v450_v25  ;;  %1054 = vrcp.f32 %v1147_v22 }
 0x2e2   :  { %940 = vmatmul.msk.bf16.vlgmr.msrb.gmra.mxu3 %vm136_vm1, %v452_v26  ;;  %v1049_v27 = vpop.eup %1048 }
 0x2e3   :  { %v449_v28 = vmul.f32 %v1049_v27, %v1035_v59  ;;  %v1051_v32 = vpop.eup %1050 }
 0x2e4   :  { %v577_v35 = vmul.f32 %v1051_v32, %v1345_v57 }
 0x2e5   :  { %v451_v30 = vpack.c.bf16 %v449_v28, %v449_v28  ;;  %v1053_v33 = vpop.eup %1052 }
 0x2e6   :  { %v576_v36 = vmul.f32 %v1053_v33, %v1037_v58  ;;  %v579_v40 = vpack.c.bf16 %v577_v35, %v577_v35  ;;  %v1055_v23 = vpop.eup %1054 }
 0x2e7   :  { %939 = vmatmul.msk.bf16.vlgmr.msra.gmra.mxu2 %vm136_vm1, %v451_v30  ;;  %v690_v24 = vmul.f32 32.0, %v1055_v23  ;;  %vm694_vm9 = vweird.f32 %v1055_v23 }
 0x2e8   :  { %v578_v41 = vpack.c.bf16 %v576_v36, %v576_v36 }
 0x2e9   :  { %v691_v25 = vsub.f32 1.0, %v690_v24 }
 0x2eb   :  { %v692_v26 = vmul.f32 %v1055_v23, %v691_v25 }
 0x2ed   :  { %v693_v27 = vadd.f32 %v1055_v23, %v692_v26 }
 0x2ef   :  { %v1387_v28 = vsel %vm694_vm9, %v1055_v23, %v693_v27 }
 0x2f1   :  { %v581_v34 = vpop.permute.xlu0 %580 }
 0x2f2   :  { %v586_v37 = vsel %vm211_vm4, %v581_v34, 0 }
 0x2f3   :  { %v602_v38 = vpop.permute.xlu1 %601  ;;  %595 = vmatpush.bf16.msrb.mxu2 %v586_v37  ;;  %v990_v37 = vld [vmem:[%s1456_s8 + $0x8] sm:$0xff] }
 0x2f4   :  { %v607_v39 = vsel %vm211_vm4, %v602_v38, 0  ;;  %774 = vmatpush.bf16.msra.mxu1 %v990_v37 }
 0x2f5   :  { %616 = vmatpush.bf16.msra.mxu3 %v607_v39 }
 0x2f7   :  { %943 = vmatmul.msk.bf16.vlgmr.msrb.gmra.mxu2 %vm136_vm1, %v578_v41  ;;  %v989_v41 = vld [vmem:[%s1456_s8] sm:$0xff] }
 0x2f8   :  { %944 = vmatmul.msk.bf16.vlgmr.msra.gmra.mxu3 %vm136_vm1, %v579_v40  ;;  %775 = vmatpush.bf16.msra.mxu1 %v989_v41  ;;  %vm821_vm1 = vcmask 523264  }
 0x2f9   :  { %829 = vmatpush.bf16.msra.mxu2 %v994_v6 }
 0x2fd   :  { %830 = vmatpush.bf16.msra.mxu2 %v993_v7 }
 0x318   :  { %v343_v42 = vpop.f32.mrf.mxu2 }
 0x319   :  { %v224_v43 = vpop.f32.mrf.mxu3  ;;  %v368_v44 = vpack.c.bf16 %v343_v42, %v343_v42 }
 0x31a   :  { %v249_v45 = vpack.c.bf16 %v224_v43, %v224_v43 }
 0x31b   :  { %372 = vrot.lane.b32.xlu0 %v368_v44, %s1133_s23 }
 0x31c   :  { %252 = vst.msk [vmem:[#allocation2] sm:$0xf] %vm251_vm5, %v249_v45 }
 0x320   :  { %v345_v46 = vpop.f32.mrf.mxu2 }
 0x321   :  { %v226_v47 = vpop.f32.mrf.mxu3 }
 0x329   :  { %v245_v48 = vpop.f32.mrf.mxu3 }
 0x32a   :  { %v250_v49 = vpack.c.bf16 %v245_v48, %v245_v48 }
 0x32c   :  { %253 = vst.msk [vmem:[#allocation2 + $0x4] sm:$0xf] %vm251_vm5, %v250_v49 }
 0x331   :  { %v247_v50 = vpop.f32.mrf.mxu3 }
 0x339   :  { %v364_v51 = vpop.f32.mrf.mxu3 }
 0x33a   :  { %v369_v52 = vpack.c.bf16 %v364_v51, %v364_v51 }
 0x33c   :  { %374 = vrot.lane.b32.xlu1 %v369_v52, %s1133_s23 }
 0x341   :  { %v366_v53 = vpop.f32.mrf.mxu3 }
 0x365   :  { %v491_v54 = vpop.f32.mrf.mxu3 }
 0x366   :  { %v496_v55 = vpack.c.bf16 %v491_v54, %v491_v54 }
 0x368   :  { %501 = vrot.lane.b32.xlu1 %v496_v55, %s1145_s24 }
 0x36a   :  { %v470_v56 = vpop.f32.mrf.mxu2 }
 0x36b   :  { %v495_v57 = vpack.c.bf16 %v470_v56, %v470_v56 }
 0x36d   :  { %v493_v59 = vpop.f32.mrf.mxu3  ;;  %499 = vrot.lane.b32.xlu0 %v495_v57, %s1145_s24  ;;  %v1016_v57 = vld [vmem:[%s1454_s6] ss:$0 sm:$0xff] }
 0x372   :  { %v472_v60 = vpop.f32.mrf.mxu2 }
 0x37a   :  { %v597_v61 = vpop.f32.mrf.mxu2 }
 0x37b   :  { %v618_v58 = vpop.f32.mrf.mxu3  ;;  %v622_v62 = vpack.c.bf16 %v597_v61, %v597_v61 }
 0x37c   :  { %v623_v63 = vpack.c.bf16 %v618_v58, %v618_v58  ;;  %v1017_v58 = vld [vmem:[%s1455_s7] ss:$0 sm:$0xff] }
 0x37d   :  { %626 = vrot.lane.b32.xlu2 %v622_v62, %s1146_s1 }
 0x37e   :  { %628 = vrot.lane.b32.xlu0 %v623_v63, %s1146_s1 }
 0x382   :  { %v599_v0 = vpop.f32.mrf.mxu2 }
 0x383   :  { %v620_v1 = vpop.f32.mrf.mxu3 }
 0x38d   :  { %v373_v4 = vpop.permute.xlu0 %372 }
 0x38e   :  { %379 = vst.msk [vmem:[#allocation2] sm:$0xf] %vm378_vm6, %v373_v4 }
 0x3ae   :  { %v375_v5 = vpop.permute.xlu1 %374 }
 0x3af   :  { %380 = vst.msk [vmem:[#allocation2 + $0x4] sm:$0xf] %vm378_vm6, %v375_v5 }
 0x3d7   :  { %v627_v10 = vpop.permute.xlu2 %626 }
 0x3da   :  { %v502_v8 = vpop.permute.xlu1 %501 }
 0x3db   :  { %507 = vst.msk [vmem:[#allocation2 + $0x4] sm:$0xf] %vm505_vm7, %v502_v8  ;;  %v992_v8 = vld [vmem:[%s1458_s10 + $0x8] sm:$0xff] }
 0x3dc   :  { %831 = vmatpush.bf16.msra.mxu2 %v992_v8 }
 0x3df   :  { %v500_v9 = vpop.permute.xlu0 %499 }
 0x3e0   :  { %506 = vst.msk [vmem:[#allocation2] sm:$0xf] %vm505_vm7, %v500_v9  ;;  %v991_v9 = vld [vmem:[%s1458_s10] sm:$0xff] }
 0x3e1   :  { %633 = vst.msk [vmem:[#allocation2] sm:$0xf] %vm632_vm8, %v627_v10  ;;  %832 = vmatpush.bf16.msra.mxu2 %v991_v9 }
 0x3f0   :  { %v629_v15 = vpop.permute.xlu0 %628 }
 0x3f1   :  { %634 = vst.msk [vmem:[#allocation2 + $0x4] sm:$0xf] %vm632_vm8, %v629_v15  ;;  %v1018_v15 = vld [vmem:[%s1457_s9] ss:$0 sm:$0xff] }
 0x3f8   :  { %v986_v11 = vld [vmem:[#allocation2] sm:$0xff] }
 0x3f9   :  { %957 = vmatmul.msk.bf16.vlgmr.msra.gmra.mxu0 %vm102_vm0, %v986_v11 }
 0x476   :  { %v674_v13 = vpop.f32.mrf.mxu0 }
 0x477   :  { %v675_v14 = vadd.f32 %v1015_v12, %v674_v13 }
 0x479   :  { %v679_v16 = vadd.f32 %v675_v14, %v1239_v2 }
 0x47b   :  { %v683_v17 = vsel %vm102_vm0, %v679_v16, 0.0 }
 0x47c   :  { %684 = vadd.xlane.f32.xlu1 %v683_v17 }
 0x47e   :  { %v676_v18 = vpop.f32.mrf.mxu0 }
 0x47f   :  { %v677_v19 = vadd.f32 %v1015_v12, %v676_v18  ;;  %v1019_v18 = vld [vmem:[%s1459_s11] ss:$0 sm:$0xff] }
 0x481   :  { %v680_v20 = vadd.f32 %v677_v19, %v1241_v3 }
 0x483   :  { %v686_v21 = vsel %vm102_vm0, %v680_v20, 0.0 }
 0x484   :  { %687 = vadd.xlane.f32.xlu0 %v686_v21 }
 0x4ef   :  { %v685_v2 = vpop.xlane.xlu1 %684 }
 0x4f0   :  { %v696_v29 = vmul.f32 %v1387_v28, %v685_v2 }
 0x4f2   :  { %v698_v30 = vsub.f32 %v679_v16, %v696_v29 }
 0x4f4   :  { %v700_v31 = vmul.f32 %v698_v30, %v698_v30 }
 0x4f6   :  { %v702_v3 = vsel %vm102_vm0, %v700_v31, 0.0 }
 0x4f7   :  { %v688_v32 = vpop.xlane.xlu0 %687  ;;  %703 = vadd.xlane.f32.xlu2 %v702_v3 }
 0x4f8   :  { %v697_v33 = vmul.f32 %v1387_v28, %v688_v32 }
 0x4fa   :  { %v699_v34 = vsub.f32 %v680_v20, %v697_v33 }
 0x4fc   :  { %v701_v35 = vmul.f32 %v699_v34, %v699_v34 }
 0x4fe   :  { %v705_v36 = vsel %vm102_vm0, %v701_v35, 0.0 }
 0x4ff   :  { %706 = vadd.xlane.f32.xlu1 %v705_v36 }
 0x56a   :  { %v704_v38 = vpop.xlane.xlu2 %703 }
 0x56b   :  { %v708_v39 = vmul.f32 %v704_v38, %v1387_v28 }
 0x56d   :  { %v710_v40 = vadd.f32 1e-05, %v708_v39 }
 0x56f   :  { %1056 = vrsqrt.f32 %v710_v40  ;;  %vm718_vm11 = vweird.f32 %v710_v40 }
 0x572   :  { %v707_v42 = vpop.xlane.xlu1 %706 }
 0x573   :  { %v709_v43 = vmul.f32 %v707_v42, %v1387_v28 }
 0x575   :  { %v1057_v44 = vpop.eup %1056  ;;  %v711_v45 = vadd.f32 1e-05, %v709_v43 }
 0x576   :  { %v713_v46 = vmul.f32 %v1057_v44, %v710_v40  ;;  %vm719_vm10 = vweird.f32 %v1057_v44 }
 0x577   :  { %1058 = vrsqrt.f32 %v711_v45  ;;  %vm720_vm12 = vmor %vm718_vm11, %vm719_vm10  ;;  %vm728_vm14 = vweird.f32 %v711_v45 }
 0x578   :  { %v714_v47 = vmul.f32 %v1057_v44, %v713_v46 }
 0x57a   :  { %v715_v48 = vmul.f32 0.5, %v714_v47 }
 0x57c   :  { %v716_v49 = vsub.f32 1.5, %v715_v48 }
 0x57d   :  { %v1059_v50 = vpop.eup %1058 }
 0x57e   :  { %v717_v51 = vmul.f32 %v1057_v44, %v716_v49  ;;  %v723_v52 = vmul.f32 %v1059_v50, %v711_v45  ;;  %vm729_vm13 = vweird.f32 %v1059_v50 }
 0x57f   :  { %vm730_vm15 = vmor %vm728_vm14, %vm729_vm13 }
 0x580   :  { %v724_v53 = vmul.f32 %v1059_v50, %v723_v52  ;;  %v721_v54 = vsel %vm720_vm12, %v1057_v44, %v717_v51 }
 0x581   :  { %v732_v59 = vmul.f32 %v721_v54, %v698_v30 }
 0x582   :  { %v725_v55 = vmul.f32 0.5, %v724_v53  ;;  %v1021_v53 = vld [vmem:[%s1461_s13] ss:$0 sm:$0xff] }
 0x583   :  { %v737_v62 = vmul.f32 %v1016_v57, %v732_v59 }
 0x584   :  { %v726_v56 = vsub.f32 1.5, %v725_v55 }
 0x585   :  { %v742_v1 = vadd.f32 %v1017_v58, %v737_v62 }
 0x586   :  { %v727_v60 = vmul.f32 %v1059_v50, %v726_v56 }
 0x588   :  { %v731_v61 = vsel %vm730_vm15, %v1059_v50, %v727_v60  ;;  %v1020_v50 = vld [vmem:[%s1460_s12] ss:$0 sm:$0xff]  ;;  %s1148_s12 = smov [#allocation8]  }
 0x589   :  { %v733_v63 = vmul.f32 %v731_v61, %v699_v34  ;;  %s903_s28 = sshll.u32 %s1148_s12, 4  ;;  %s904_s28 = int_to_ptr.vmem [resolvable:$true] %s903_s28 }
 0x58b   :  { %v738_v0 = vmul.f32 %v1016_v57, %v733_v63 }
 0x58d   :  { %v743_v4 = vadd.f32 %v1017_v58, %v738_v0 }
 0x58f   :  { %v744_v5 = vpack.c.bf16 %v743_v4, %v742_v1 }
 0x591   :  { %966 = vmatmul.msk.bf16.vlgmr.msra.gmra.mxu1 %vm102_vm0, %v744_v5 }
 0x60e   :  { %v777_v10 = vpop.f32.mrf.mxu1 }
 0x60f   :  { %v778_v11 = vadd.f32 %v1018_v15, %v777_v10 }
 0x611   :  { %v782_v14 = vmax.f32 %v778_v11, 0.0 }
 0x616   :  { %v779_v12 = vpop.f32.mrf.mxu1 }
 0x617   :  { %v780_v13 = vadd.f32 %v1018_v15, %v779_v12 }
 0x619   :  { %v783_v16 = vmax.f32 %v780_v13, 0.0 }
 0x61b   :  { %v784_v17 = vpack.c.bf16 %v783_v16, %v782_v14 }
 0x61d   :  { %983 = vmatmul.msk.bf16.vlgmr.msra.gmra.mxu2 %vm821_vm1, %v784_v17 }
 0x6a0   :  { %v834_v19 = vpop.f32.mrf.mxu2 }
 0x6a1   :  { %v835_v20 = vadd.f32 %v1019_v18, %v834_v19 }
 0x6a3   :  { %v839_v21 = vadd.f32 %v835_v20, %v742_v1 }
 0x6a5   :  { %v843_v22 = vsel %vm102_vm0, %v839_v21, 0.0 }
 0x6a6   :  { %844 = vadd.xlane.f32.xlu0 %v843_v22 }
 0x6a8   :  { %v836_v23 = vpop.f32.mrf.mxu2 }
 0x6a9   :  { %v837_v24 = vadd.f32 %v1019_v18, %v836_v23 }
 0x6ab   :  { %v840_v25 = vadd.f32 %v837_v24, %v743_v4 }
 0x6ad   :  { %v846_v26 = vsel %vm102_vm0, %v840_v25, 0.0 }
 0x6ae   :  { %847 = vadd.xlane.f32.xlu1 %v846_v26 }
 0x719   :  { %v845_v27 = vpop.xlane.xlu0 %844 }
 0x71a   :  { %v849_v2 = vmul.f32 %v845_v27, %v1387_v28 }
 0x71c   :  { %v851_v29 = vsub.f32 %v839_v21, %v849_v2 }
 0x71e   :  { %v853_v30 = vmul.f32 %v851_v29, %v851_v29 }
 0x720   :  { %v855_v31 = vsel %vm102_vm0, %v853_v30, 0.0 }
 0x721   :  { %v848_v3 = vpop.xlane.xlu1 %847  ;;  %856 = vadd.xlane.f32.xlu0 %v855_v31 }
 0x722   :  { %v850_v32 = vmul.f32 %v848_v3, %v1387_v28 }
 0x724   :  { %v852_v33 = vsub.f32 %v840_v25, %v850_v32 }
 0x726   :  { %v854_v34 = vmul.f32 %v852_v33, %v852_v33 }
 0x728   :  { %v858_v35 = vsel %vm102_vm0, %v854_v34, 0.0 }
 0x729   :  { %859 = vadd.xlane.f32.xlu1 %v858_v35 }
 0x794   :  { %v857_v36 = vpop.xlane.xlu0 %856 }
 0x795   :  { %v861_v37 = vmul.f32 %v857_v36, %v1387_v28 }
 0x797   :  { %v863_v38 = vadd.f32 1e-05, %v861_v37 }
 0x799   :  { %1060 = vrsqrt.f32 %v863_v38  ;;  %vm871_vm3 = vweird.f32 %v863_v38 }
 0x79c   :  { %v860_v39 = vpop.xlane.xlu1 %859 }
 0x79d   :  { %v862_v40 = vmul.f32 %v860_v39, %v1387_v28 }
 0x79f   :  { %v1061_v41 = vpop.eup %1060  ;;  %v864_v42 = vadd.f32 1e-05, %v862_v40 }
 0x7a0   :  { %v866_v43 = vmul.f32 %v1061_v41, %v863_v38  ;;  %vm872_vm2 = vweird.f32 %v1061_v41 }
 0x7a1   :  { %1062 = vrsqrt.f32 %v864_v42  ;;  %vm873_vm4 = vmor %vm871_vm3, %vm872_vm2  ;;  %vm881_vm6 = vweird.f32 %v864_v42 }
 0x7a2   :  { %v867_v44 = vmul.f32 %v1061_v41, %v866_v43 }
 0x7a4   :  { %v868_v45 = vmul.f32 0.5, %v867_v44 }
 0x7a6   :  { %v869_v46 = vsub.f32 1.5, %v868_v45 }
 0x7a7   :  { %v1063_v47 = vpop.eup %1062 }
 0x7a8   :  { %v870_v48 = vmul.f32 %v1061_v41, %v869_v46  ;;  %v876_v49 = vmul.f32 %v1063_v47, %v864_v42  ;;  %vm882_vm5 = vweird.f32 %v1063_v47 }
 0x7a9   :  { %vm883_vm7 = vmor %vm881_vm6, %vm882_vm5 }
 0x7aa   :  { %v874_v51 = vsel %vm873_vm4, %v1061_v41, %v870_v48  ;;  %v877_v52 = vmul.f32 %v1063_v47, %v876_v49 }
 0x7ab   :  { %v885_v28 = vmul.f32 %v874_v51, %v851_v29 }
 0x7ac   :  { %v878_v54 = vmul.f32 0.5, %v877_v52 }
 0x7ad   :  { %v890_v55 = vmul.f32 %v1020_v50, %v885_v28 }
 0x7ae   :  { %v879_v56 = vsub.f32 1.5, %v878_v54 }
 0x7af   :  { %v895_v57 = vadd.f32 %v1021_v53, %v890_v55 }
 0x7b0   :  { %v880_v59 = vmul.f32 %v1063_v47, %v879_v56 }
 0x7b1   :  { %897 = vst.msk [vmem:[#allocation8] sm:$0xff] %vm102_vm0, %v895_v57 }
 0x7b2   :  { %v884_v60 = vsel %vm883_vm7, %v1063_v47, %v880_v59 }
 0x7b3   :  { %v886_v61 = vmul.f32 %v884_v60, %v852_v33 }
 0x7b5   :  { %v891_v58 = vmul.f32 %v1020_v50, %v886_v61 }
 0x7b7   :  { %v896_v62 = vadd.f32 %v1021_v53, %v891_v58 }
 0x7b9   :  { %898 = vst.msk [vmem:[#allocation8 + $0x8] sm:$0xff] %vm102_vm0, %v896_v62 }
 0x7ba   :  { %911 = dma.vmem_to_hbm [thread:$0]  %s904_s28, 256, %s906_s5, [#allocation5], %s1132_s22, %s1132_s22, %s1133_s23  }
 0x7bb   :  { %1128 = dma.done.wait [#allocation5], 256  }
 0x7bc   :  { %1129 = vsyncadd [#allocation5], 4294967040 }
 0x7bd   :  { %916 = vsyncpa [#allocation4], 1 }
 0x7be   :  { %917 = vsyncpa [#allocation5], 1 }
 0x7bf   :  { %918 = vsyncpa [#allocation6], 1 }

</bundles_post_ra>
